<compile_context>
chip_gen: v7x
topology: tpu7x:2x2x1
jax: 0.10.0
libtpu: 0.0.40
codegen_flags: <defaults>
</compile_context>

<pallas_src>
import jax
import jax.numpy as jnp
from jax.experimental import pallas as pl
from jax.experimental.pallas import tpu as pltpu


def mlp_kernel(xt_ref, w1_ref, b1_ref, w2_ref, b2_ref, w3_ref, b3_ref, o_ref):
    # Feature dims (13/10/15/1) sit on sublanes; the batch tile sits on lanes.
    xt = xt_ref[...]                                                      # (13, TB)
    h1 = jnp.dot(w1_ref[...], xt, preferred_element_type=jnp.float32)     # (10, TB)
    h1 = jnp.maximum(h1 + b1_ref[...], 0.0)                               # ReLU
    h2 = jnp.dot(w2_ref[...], h1, preferred_element_type=jnp.float32)     # (15, TB)
    h2 = jnp.maximum(h2 + b2_ref[...], 0.0)                               # ReLU
    o_ref[...] = (jnp.dot(w3_ref[...], h2, preferred_element_type=jnp.float32)
                  + b3_ref[...])                                          # (1, TB)


def mlp_forward(x, w1, b1, w2, b2, w3, b3, *, tb=512):
    """x: (B, 13) f32 (PyTorch layout). Returns (B, 1) f32."""
    B = x.shape[0]

    # Batch tile lives on the lane axis -> multiple of 128, capped by batch.
    b_pad128 = ((B + 127) // 128) * 128
    tb = max(128, min(tb, b_pad128))
    b_pad = ((B + tb - 1) // tb) * tb
    grid = (b_pad // tb,)

    # Lane-dense, padded input stream: (13, B_pad).
    xt = jnp.pad(x.T, ((0, 0), (0, b_pad - B)))

    param_bytes = sum(int(p.size) * p.dtype.itemsize
                      for p in (w1, b1, w2, b2, w3, b3))
    cost = pl.CostEstimate(
        flops=2 * b_pad * (13 * 10 + 10 * 15 + 15 * 1),
        transcendentals=0,
        bytes_accessed=b_pad * 13 * 4 + b_pad * 4 + param_bytes,
    )

    def resident(shape):
        # Full-array block, constant index_map -> stays in VMEM across steps.
        return pl.BlockSpec(shape, lambda i: (0, 0))

    out_padded = pl.pallas_call(
        mlp_kernel,
        out_shape=jax.ShapeDtypeStruct((1, b_pad), jnp.float32),
        grid=grid,
        in_specs=[
            pl.BlockSpec((13, tb), lambda i: (0, i)),    # streamed + pipelined
            resident(w1.shape), resident(b1.shape),
            resident(w2.shape), resident(b2.shape),
            resident(w3.shape), resident(b3.shape),
        ],
        out_specs=pl.BlockSpec((1, tb), lambda i: (0, i)),   # lane-dense output
        compiler_params=pltpu.CompilerParams(
            dimension_semantics=("parallel",)),
        cost_estimate=cost,
    )(xt, w1, b1, w2, b2, w3, b3)

    # Back to PyTorch layout (B, 1); drop the batch padding.
    return out_padded[:, :B].T


def init_params(key):
    """PyTorch nn.Linear-style init: U(-1/sqrt(fan_in), 1/sqrt(fan_in)).
    Weights stored (out_features, in_features); biases as (out_features, 1)
    columns so they broadcast over the lane (batch) axis in the kernel."""
    def linear(key, fan_in, fan_out):
        kw, kb = jax.random.split(key)
        bound = 1.0 / jnp.sqrt(float(fan_in))
        w = jax.random.uniform(kw, (fan_out, fan_in), jnp.float32, -bound, bound)
        b = jax.random.uniform(kb, (fan_out, 1), jnp.float32, -bound, bound)
        return w, b

    k1, k2, k3 = jax.random.split(key, 3)
    w1, b1 = linear(k1, 13, 10)
    w2, b2 = linear(k2, 10, 15)
    w3, b3 = linear(k3, 15, 1)
    return w1, b1, w2, b2, w3, b3


def reference_forward(x, w1, b1, w2, b2, w3, b3):
    h1 = jnp.maximum(x @ w1.T + b1[:, 0], 0.0)
    h2 = jnp.maximum(h1 @ w2.T + b2[:, 0], 0.0)
    return h2 @ w3.T + b3[:, 0]


if __name__ == "__main__":
    key = jax.random.PRNGKey(0)
    kx, kp = jax.random.split(key)

    B = 256                                       # small batch; tb=128 -> 2 grid steps
    x = jax.random.normal(kx, (B, 13), jnp.float32)
    params = init_params(kp)

    out = mlp_forward(x, *params, tb=128)
    out = jax.block_until_ready(out)

    ref = reference_forward(x, *params)
    assert out.shape == (B, 1)
    assert jnp.allclose(out, ref, atol=1e-5, rtol=1e-5), "mismatch vs reference"

    print("KERNEL_OK")
</pallas_src>

<mosaic_0001>
module attributes {stable_mosaic.version = 11 : i64} {
  func.func @mlp_kernel(%arg0: i32, %arg1: memref<13x128xf32, #tpu.memory_space<vmem>>, %arg2: memref<10x13xf32, #tpu.memory_space<vmem>>, %arg3: memref<10x1xf32, #tpu.memory_space<vmem>>, %arg4: memref<15x10xf32, #tpu.memory_space<vmem>>, %arg5: memref<15x1xf32, #tpu.memory_space<vmem>>, %arg6: memref<1x15xf32, #tpu.memory_space<vmem>>, %arg7: memref<1x1xf32, #tpu.memory_space<vmem>>, %arg8: memref<1x128xf32, #tpu.memory_space<vmem>>) attributes {dimension_semantics = [#tpu.dimension_semantics<parallel>], iteration_bounds = array<i64: 2>, scalar_prefetch = 0 : i64, scratch_operands = 0 : i64, tpu.core_type = #tpu.core_type<tc>, window_params = [{transform_indices = @transform_0, window_bounds = array<i64: 13, 128>}, {pipeline_mode = #tpu.pipeline_mode<synchronous>, transform_indices = @transform_1, window_bounds = array<i64: 10, 13>}, {pipeline_mode = #tpu.pipeline_mode<synchronous>, transform_indices = @transform_2, window_bounds = array<i64: 10, 1>}, {pipeline_mode = #tpu.pipeline_mode<synchronous>, transform_indices = @transform_3, window_bounds = array<i64: 15, 10>}, {pipeline_mode = #tpu.pipeline_mode<synchronous>, transform_indices = @transform_4, window_bounds = array<i64: 15, 1>}, {pipeline_mode = #tpu.pipeline_mode<synchronous>, transform_indices = @transform_5, window_bounds = array<i64: 1, 15>}, {pipeline_mode = #tpu.pipeline_mode<synchronous>, transform_indices = @transform_6, window_bounds = array<i64: 1, 1>}, {transform_indices = @transform_7, window_bounds = array<i64: 1, 128>}]} {
    %c0 = arith.constant 0 : index
    %c0_0 = arith.constant 0 : index
    %0 = vector.load %arg1[%c0, %c0_0] : memref<13x128xf32, #tpu.memory_space<vmem>>, vector<13x128xf32>
    %c0_1 = arith.constant 0 : index
    %c0_2 = arith.constant 0 : index
    %1 = vector.load %arg2[%c0_1, %c0_2] : memref<10x13xf32, #tpu.memory_space<vmem>>, vector<10x13xf32>
    %cst = arith.constant dense<0.000000e+00> : vector<10x128xf32>
    %2 = tpu.matmul %1, %0, %cst {dimension_numbers = #tpu.dot_dimension_numbers<[1], [0], [0], [1], [0, 0, 1, 1], [], []>} : vector<10x13xf32>, vector<13x128xf32>, vector<10x128xf32> -> vector<10x128xf32>
    %c0_3 = arith.constant 0 : index
    %c0_4 = arith.constant 0 : index
    %3 = vector.load %arg3[%c0_3, %c0_4] : memref<10x1xf32, #tpu.memory_space<vmem>>, vector<10x1xf32>
    %4 = vector.broadcast %3 : vector<10x1xf32> to vector<10x128xf32>
    %5 = arith.addf %2, %4 : vector<10x128xf32>
    %cst_5 = arith.constant 0.000000e+00 : f32
    %6 = vector.broadcast %cst_5 : f32 to vector<10x128xf32>
    %7 = arith.maximumf %5, %6 : vector<10x128xf32>
    %c0_6 = arith.constant 0 : index
    %c0_7 = arith.constant 0 : index
    %8 = vector.load %arg4[%c0_6, %c0_7] : memref<15x10xf32, #tpu.memory_space<vmem>>, vector<15x10xf32>
    %cst_8 = arith.constant dense<0.000000e+00> : vector<15x128xf32>
    %9 = tpu.matmul %8, %7, %cst_8 {dimension_numbers = #tpu.dot_dimension_numbers<[1], [0], [0], [1], [0, 0, 1, 1], [], []>} : vector<15x10xf32>, vector<10x128xf32>, vector<15x128xf32> -> vector<15x128xf32>
    %c0_9 = arith.constant 0 : index
    %c0_10 = arith.constant 0 : index
    %10 = vector.load %arg5[%c0_9, %c0_10] : memref<15x1xf32, #tpu.memory_space<vmem>>, vector<15x1xf32>
    %11 = vector.broadcast %10 : vector<15x1xf32> to vector<15x128xf32>
    %12 = arith.addf %9, %11 : vector<15x128xf32>
    %cst_11 = arith.constant 0.000000e+00 : f32
    %13 = vector.broadcast %cst_11 : f32 to vector<15x128xf32>
    %14 = arith.maximumf %12, %13 : vector<15x128xf32>
    %c0_12 = arith.constant 0 : index
    %c0_13 = arith.constant 0 : index
    %15 = vector.load %arg6[%c0_12, %c0_13] : memref<1x15xf32, #tpu.memory_space<vmem>>, vector<1x15xf32>
    %cst_14 = arith.constant dense<0.000000e+00> : vector<1x128xf32>
    %16 = tpu.matmul %15, %14, %cst_14 {dimension_numbers = #tpu.dot_dimension_numbers<[1], [0], [0], [1], [0, 0, 1, 1], [], []>} : vector<1x15xf32>, vector<15x128xf32>, vector<1x128xf32> -> vector<1x128xf32>
    %c0_15 = arith.constant 0 : index
    %c0_16 = arith.constant 0 : index
    %17 = vector.load %arg7[%c0_15, %c0_16] : memref<1x1xf32, #tpu.memory_space<vmem>>, vector<1x1xf32>
    %18 = vector.broadcast %17 : vector<1x1xf32> to vector<1x128xf32>
    %19 = arith.addf %16, %18 : vector<1x128xf32>
    %c0_17 = arith.constant 0 : index
    %c0_18 = arith.constant 0 : index
    %20 = vector.load %arg8[%c0_17, %c0_18] : memref<1x128xf32, #tpu.memory_space<vmem>>, vector<1x128xf32>
    tpu.vector_store %arg8[%c0_17, %c0_18], %19 {strides = array<i32>} : memref<1x128xf32, #tpu.memory_space<vmem>>, vector<1x128xf32>,
    return
  }
  func.func @transform_0(%arg0: i32) -> (i32, i32) {
    %c0_i32 = arith.constant 0 : i32
    %c0_i32_0 = arith.constant 0 : i32
    return %c0_i32, %arg0 : i32, i32
  }
  func.func @transform_1(%arg0: i32) -> (i32, i32) {
    %c0_i32 = arith.constant 0 : i32
    %c0_i32_0 = arith.constant 0 : i32
    %c0_i32_1 = arith.constant 0 : i32
    return %c0_i32, %c0_i32_0 : i32, i32
  }
  func.func @transform_2(%arg0: i32) -> (i32, i32) {
    %c0_i32 = arith.constant 0 : i32
    %c0_i32_0 = arith.constant 0 : i32
    %c0_i32_1 = arith.constant 0 : i32
    return %c0_i32, %c0_i32_0 : i32, i32
  }
  func.func @transform_3(%arg0: i32) -> (i32, i32) {
    %c0_i32 = arith.constant 0 : i32
    %c0_i32_0 = arith.constant 0 : i32
    %c0_i32_1 = arith.constant 0 : i32
    return %c0_i32, %c0_i32_0 : i32, i32
  }
  func.func @transform_4(%arg0: i32) -> (i32, i32) {
    %c0_i32 = arith.constant 0 : i32
    %c0_i32_0 = arith.constant 0 : i32
    %c0_i32_1 = arith.constant 0 : i32
    return %c0_i32, %c0_i32_0 : i32, i32
  }
  func.func @transform_5(%arg0: i32) -> (i32, i32) {
    %c0_i32 = arith.constant 0 : i32
    %c0_i32_0 = arith.constant 0 : i32
    %c0_i32_1 = arith.constant 0 : i32
    return %c0_i32, %c0_i32_0 : i32, i32
  }
  func.func @transform_6(%arg0: i32) -> (i32, i32) {
    %c0_i32 = arith.constant 0 : i32
    %c0_i32_0 = arith.constant 0 : i32
    %c0_i32_1 = arith.constant 0 : i32
    return %c0_i32, %c0_i32_0 : i32, i32
  }
  func.func @transform_7(%arg0: i32) -> (i32, i32) {
    %c0_i32 = arith.constant 0 : i32
    %c0_i32_0 = arith.constant 0 : i32
    return %c0_i32, %arg0 : i32, i32
  }
}

</mosaic_0001>

<bundles_post_ra>
// kernel: tpu_custom_call.1
= control target key start
LH: loop header
LB: loop body
LE: loop exit
PB: predicated region body
PF: predicated region fallthrough
CT: control target
= control target key end

     0   :  { %s1165_s0 = inlined_call_operand.vmem [shape: f32[13,256], index: 0, kind: input, shape index: {}]   ;;  %s1166_s1 = inlined_call_operand.hbm [shape: f32[10,13], index: 1, kind: input, shape index: {}]   ;;  %s1167_s2 = inlined_call_operand.vmem [shape: f32[10,1], index: 2, kind: input, shape index: {}]   ;;  %s1168_s3 = inlined_call_operand.vmem [shape: f32[15,10], index: 3, kind: input, shape index: {}]   ;;  %s1169_s4 = inlined_call_operand.vmem [shape: f32[15,1], index: 4, kind: input, shape index: {}]   ;;  %s1170_s5 = inlined_call_operand.vmem [shape: f32[1,15], index: 5, kind: input, shape index: {}]   ;;  %s1171_s6 = inlined_call_operand.<no memory space> [shape: f32[1,1], index: 6, kind: input, shape index: {}]   ;;  %s1172_s7 = inlined_call_operand.hbm [shape: f32[1,256], index: 7, kind: output, shape index: {}]  }
   0x1   :  { %v12_v0 = vstv %s1171_s6 }
   0x2   :  { %13 = vst [vmem:[#allocation2] sm:$0x1] %v12_v0 }
   0x3   :  { %14 = vsyncpa [#allocation5], 0 }
   0x4   :  { %15 = vsyncpa [#allocation6], 0 }
   0x5   :  { %17 = vsyncpa [#allocation6 + $0x1], 0  ;;  %s988_s26 = smov 0   ;;  %s990_s27 = smov 0  }
   0x6   :  { %s992_s28 = smov 0   ;;  %s994_s29 = smov 0  }
   0x7 LB: > { %s1009_s6 = sadd.s32 4294967295, %s934_s29   ;;  %s713_s30 = sadd.s32 4294967294, %s934_s29   ;;  %s934_s29 = sphi %s994_s29, %s1190_s29   ;;  %s930_s28 = sphi %s992_s28, %s1189_s28   ;;  %s926_s27 = sphi %s990_s27, %s1188_s27   ;;  %s922_s26 = sphi %s988_s26, %s1187_s26  }
   0x8   : > { %s1013_s8 = sadd.s32 1, %s934_s29   ;;  %s30_s9 = sadd.s32 1, %s930_s28 }
   0x9   : > { %s27_s10 = ssub.s32 %s934_s29, %s1013_s8  ;;  %p37_p0 = scmp.ne.s32.totalorder %s930_s28, %s926_s27 }
   0xa   : > { %p28_p1 = scmp.eq.s32.totalorder %s27_s10, 0  ;;  %p38_p2 = scmp.eq.s32.totalorder %s934_s29, 0 }
   0xb   : > { %p193_p3 = scmp.eq.s32.totalorder %s1009_s6, 1  ;;  %p198_p4 = scmp.ne.s32.totalorder %s926_s27, %s922_s26 }
   0xc   : > { %s1025_s11 = scalar_select %p28_p1, %s930_s28, %s30_s9  }
   0xd   : > { %p1027_p5 = por %p38_p2, %p37_p0  ;;  %p1031_p6 = por %p193_p3, %p37_p0 }
   0xe   : > { %p199_p7 = scmp.eq.s32.totalorder %s713_s30, 1  ;;  %p714_p8 = scmp.ge.s32.totalorder %s934_s29, 1 }
   0xf   : > { %s1176_s12 = scalar_select %p1027_p5, 1, 0 }
  0x10   : > { %s1177_s13 = scalar_select %p1031_p6, 1, 0 }
  0x11   : > { %p206_p9 = scmp.lt.s32.totalorder %s934_s29, 3  ;;  %p1037_p10 = por %p199_p7, %p198_p4 }
  0x12   : > { %p1173_p11 = scmp.eq.s32.totalorder %s1009_s6, 0  ;;  %s936_s16 = smov [#allocation4]  }
  0x13   : > { %s1178_s14 = scalar_select %p1037_p10, 1, 0 }
  0x14   : > { %p1042_p12 = pnand %p714_p8, %p206_p9  ;;  %s218_s17 = sshll.u32 %s936_s16, 4  ;;  %s219_s17 = int_to_ptr.vmem [resolvable:$true] %s218_s17 }
  0x15   : > { %s840_s21 = scalar_lea.hbm %s1166_s1, 256 }
  0x16   : > { %s1179_s15 = scalar_select %p1042_p12, 1, 0 }
  0x17   : > { %p787_p13 = pneg %p1042_p12  ;;  %p841_p1 = scmp.ne.s32.totalorder %s1166_s1, %s840_s21 }
  0x18   : > { %p847_p7 = scmp.lt.u32.totalorder %s840_s21, %s1166_s1 }
  0x19   : > { %p1050_p0 = pnand %p1173_p11, %p787_p13 }
  0x1b   : > { %p842_p2 = pneg %p1050_p0 }
  0x1d   : > { %p843_p3 = pnand %p842_p2, %p841_p1 }
  0x1f   : > { %p844_p4 = pneg %p843_p3 }
  0x21   : > { %p849_p8 = pnand %p847_p7, %p844_p4 }
  0x23   : > { %852 = shalt.err (!%p849_p8)
}
  0x24   : > { %s853_s30 = scalar_lea.vmem %s219_s17, 256  ;;  %p861_p10 = scmp.lt.s32.totalorder %s219_s17, %s219_s17 }
  0x25   : > { %p854_p9 = scmp.ne.s32.totalorder %s219_s17, %s853_s30  ;;  %p862_p6 = scmp.lt.s32.totalorder %s853_s30, %s853_s30 }
  0x27   : > { %p856_p13 = pnand %p854_p9, %p842_p2  ;;  %p863_p12 = por %p862_p6, %p861_p10 }
  0x29   : > { %p857_p11 = pneg %p856_p13 }
  0x2b   : > { %p864_p5 = pnand %p863_p12, %p857_p11 }
  0x2d   : > { %867 = shalt.err (!%p864_p5)
}
  0x2e   : > { %s937_s9 = smov 128   ;;  %s938_s10 = smov 8  }
  0x2f   : > { %790 = dma.hbm_to_vmem [thread:$0]  (!%p1050_p0), %s1166_s1, 256, %s219_s17, [#allocation5], %s937_s9, %s937_s9, %s938_s10  }
  0x30   : > { %p716_p1 = scmp.ge.s32.totalorder %s934_s29, 2 }
  0x31   : > { %p1181_p2 = scmp.ne.s32.totalorder (!%p716_p1), %s1176_s12, 0 }
  0x32   : > { %243 = sbr.rel (%p716_p1) target bundleno = 64 (0x40), region = 40 }
  0x39   : > { %246 = sbr.rel (!%p1181_p2) target bundleno = 64 (0x40), region = 44  ;;  %s248_s20 = sand.u32 (%p1181_p2), 1, %s930_s28  }
  0x3a   : > { %s718_s21 = sshll.u32 (%p1181_p2), %s934_s29, 3  ;;  %s717_s22 = sshll.u32 (%p1181_p2), %s248_s20, 4 }
  0x3b   : > { %s252_s18 = scalar_lea.vmem (%p1181_p2), %s1165_s0, %s718_s21  ;;  %s250_s17 = scalar_lea.vmem (%p1181_p2), [#allocation3], %s717_s22 }
  0x3c   : > { %v282_v1 = vld [vmem:[%s252_s18] sm:$0xff] (%p1181_p2)  ;;  %v284_v2 = vld [vmem:[%s252_s18 + $0x10] sm:$0xff] (%p1181_p2) }
  0x3d   : > { %283 = vst [vmem:[%s250_s17] sm:$0xff] (%p1181_p2), %v282_v1  ;;  %285 = vst [vmem:[%s250_s17 + $0x8] sm:$0xff] (%p1181_p2), %v284_v2 }
  0x40 PF: > { %p1182_p5 = scmp.ne.s32.totalorder %s1179_s15, 0 }
  0x41   : > { %s1083_s12 = sand.u32 (!%p1182_p5), 1, %s926_s27   ;;  %p1183_p6 = scmp.eq.s32.totalorder (!%p1182_p5), %s1009_s6, 0 }
  0x42   : > { %294 = sbr.rel (%p1182_p5) target bundleno = 755 (0x2f3), region = 82  ;;  %s720_s25 = sshll.u32 (!%p1182_p5), %s1083_s12, 4 }
  0x43   : > { %s299_s30 = scalar_lea.vmem (!%p1182_p5), [#allocation3], %s720_s25 }
  0x49   : > { %913 = dma.done.wait (%p1183_p6), [#allocation5], 256   ;;  %p1184_p10 = pmov %p1183_p6 }
  0x4a   : > { %v939_v3 = vmov 0   ;;  %vm354_vm0 = vcmask 1044480   ;;  %vm347_vm1 = vcmask 105472   ;;  %vm940_vm2 = vmmov 1   ;;  %v331_v4 = vld [vmem:[%s299_s30] sm:$0xff]  ;;  %s730_s15 = sshll.u32 %s1009_s6, 4 }
  0x4b   : > { %915 = vsyncadd (%p1184_p10), [#allocation5], 4294967040  ;;  %838 = vset.pattern.permute.xlu0 %v939_v3  ;;  %839 = vset.pattern.permute.xlu1 %v939_v3  ;;  %v332_v5 = vld [vmem:[%s299_s30 + $0x8] sm:$0x1f]  ;;  %v333_v6 = vld [vmem:[#allocation4] sm:$0xff]  ;;  %vm449_vm4 = vcmask 80896   ;;  %v544_v37 = vlaneseq  ;;  %s1121_s20 = scalar_lea.hbm %s1172_s7, %s730_s15 }
  0x4c   : > { %vm766_vm3 = vmpackc.low %vm354_vm0, %vm940_vm2  ;;  %v765_v7 = vpack.c.bf16 %v332_v5, %v331_v4  ;;  %748 = vmatprep.mubr.msk.f32.mxu0 %vm347_vm1, %v333_v6  ;;  %v335_v8 = vld [vmem:[%s1167_s2] sm:$0xff]  ;;  %v336_v9 = vld [vmem:[%s1167_s2 + $0x8] sm:$0x3]  ;;  %vm456_vm5 = vcmask 1041408   ;;  %v941_v25 = vmov 0.0|0.0   ;;  %vm942_vm7 = vmmov 0  }
  0x4d   : > { %339 = vperm.xlu0 %838, %v335_v8   ;;  %v334_v10 = vld [vmem:[#allocation4 + $0x8] sm:$0x3]  ;;  %v538_v11 = vld [vmem:[#allocation2] sm:$0x1]  ;;  %vm772_vm6 = vmpackc.low %vm456_vm5, %vm940_vm2  ;;  %v943_v26 = vmov 0.0   ;;  %vm552_vm8 = vcmask 1046528  }
  0x4e   : > { %767 = vmatprep.subr.msk.bf16.mxu0 %vm766_vm3, %v765_v7  ;;  %v435_v12 = vld [vmem:[%s1168_s3] sm:$0xff]  ;;  %v438_v14 = vld [vmem:[%s1169_s4 + $0x8] sm:$0x7f]  ;;  %vm779_vm9 = vmpackc.low %vm552_vm8, %vm940_vm2  ;;  %vm548_vm10 = vcmask 121856   ;;  %v545_v38 = vshrl.u32 %v544_v37, 7  ;;  %s330_s9 = scalar_lea.vmem [#allocation7], %s1083_s12 }
  0x4f   : > { %770 = vmatpush3.bf16.msk.msra.mxu0 %vm766_vm3, %v765_v7  ;;  %755 = vmatprep.mubr.msk.f32.mxu1 %vm449_vm4, %v435_v12  ;;  %v437_v13 = vld [vmem:[%s1169_s4] sm:$0xff]  ;;  %v436_v24 = vld [vmem:[%s1168_s3 + $0x8] sm:$0x7f]  ;;  %s640_s10 = sshll.u32 %s330_s9, 4  ;;  %s628_s21 = scalar_lea.sflag [#allocation6], %s1083_s12  ;;  %s1123_s10 = int_to_ptr.vmem [resolvable:$true] %s640_s10 }
  0x50   : > { %441 = vperm.xlu1 %839, %v437_v13   ;;  %777 = vmatprep.subr.bf16.mxu0 %v941_v25  ;;  %v537_v36 = vld [vmem:[%s1170_s5] sm:$0x1]  ;;  %v546_v39 = vsub.s32 0, %v545_v38  ;;  %s868_s22 = scalar_lea.vmem %s1123_s10, 16  ;;  %p1185_p12 = scmp.ne.s32.totalorder %s1177_s13, 0 }
  0x51   : > { %344 = vperm.xlu0 %838, %v336_v9   ;;  %p869_p11 = scmp.ne.s32.totalorder %s1123_s10, %s868_s22  ;;  %s944_s6 = smov [#allocation7]  }
  0x52   : > { %749 = vmatmul.mubr.msk.f32.vlgmr.msra.gmra.mrb[0].mxu0 %vm347_vm1, %v334_v10  ;;  %s872_s23 = sshll.u32 %s944_s6, 4  ;;  %s873_s23 = int_to_ptr.vmem [resolvable:$false] %s872_s23 }
  0x53   : > { %762 = vmatprep.mubr.msk.f32.mxu0 %vm942_vm7, %v943_v26  ;;  %p870_p0 = pnand %p869_p11, %p1185_p12  ;;  %s874_s24 = scalar_lea.vmem %s873_s23, 32 }
  0x54   : > { %446 = vperm.xlu1 %839, %v438_v14   ;;  %p875_p4 = scmp.lt.s32.totalorder %s1123_s10, %s873_s23  ;;  %p876_p7 = scmp.lt.s32.totalorder %s874_s24, %s868_s22 }
  0x55   : > { %541 = vperm.xlu0 %838, %v538_v11   ;;  %p871_p3 = pneg %p870_p0 }
  0x56   : > { %p877_p8 = por %p876_p7, %p875_p4 }
  0x58   : > { %p878_p9 = pnand %p877_p8, %p871_p3 }
  0xcc   : > { %v340_v15 = vpop.permute.xlu0 %339 }
  0xcf   : > { %v442_v27 = vpop.permute.xlu1 %441 }
  0xd0   : > { %v345_v16 = vpop.permute.xlu0 %344 }
  0xd3   : > { %v447_v28 = vpop.permute.xlu1 %446 }
  0xd4   : > { %v542_v40 = vpop.permute.xlu0 %541 }
  0xd5   : > { %v547_v41 = vrot.slane %v542_v40, %v546_v39 }
 0x125   : > { %v750_v17 = vpop.f32.mrb[0].mxu0 }
 0x126   : > { %v430_v18 = vadd.f32 %v750_v17, %v345_v16  ;;  %v424_v19 = vpop.f32.mrb[1].mxu0 }
 0x127   : > { %v425_v20 = vadd.f32 %v424_v19, %v340_v15 }
 0x128   : > { %v434_v21 = vmax.f32 %v430_v18, 0.0 }
 0x129   : > { %v433_v22 = vmax.f32 %v425_v20, 0.0 }
 0x12b   : > { %v771_v23 = vpack.c.bf16 %v434_v21, %v433_v22 }
 0x12d   : > { %773 = vmatprep.subr.msk.bf16.mxu1 %vm772_vm6, %v771_v23 }
 0x12e   : > { %776 = vmatpush3.bf16.msk.msra.mxu1 %vm772_vm6, %v771_v23 }
 0x131   : > { %756 = vmatmul.mubr.msk.f32.vlgmr.msra.gmra.mrb[0].mxu1 %vm449_vm4, %v436_v24 }
 0x204   : > { %v757_v29 = vpop.f32.mrb[0].mxu1 }
 0x205   : > { %v532_v30 = vadd.f32 %v757_v29, %v447_v28  ;;  %v526_v31 = vpop.f32.mrb[1].mxu1 }
 0x206   : > { %v527_v32 = vadd.f32 %v526_v31, %v442_v27 }
 0x207   : > { %v536_v33 = vmax.f32 %v532_v30, 0.0 }
 0x208   : > { %v535_v34 = vmax.f32 %v527_v32, 0.0 }
 0x20a   : > { %v778_v35 = vpack.c.bf16 %v536_v33, %v535_v34 }
 0x20c   : > { %780 = vmatpush3.bf16.msk.msra.mxu0 %vm779_vm9, %v778_v35 }
 0x20f   : > { %763 = vmatmul.mubr.msk.f32.vlgmr.msra.gmra.mrb[2].mxu0 %vm548_vm10, %v537_v36 }
 0x2e2   : > { %v622_v42 = vpop.f32.mrb[2].mxu0 }
 0x2e3   : > { %v623_v43 = vadd.f32 %v622_v42, %v547_v41  ;;  %v764_v44 = vpop.f32.mrb[3].mxu0 }
 0x2e5   : > { %626 = vst [vmem:[%s330_s9] sm:$0x1] %v623_v43 }
 0x2e6   : > { %881 = shalt.err (!%p878_p9)
}
 0x2e7   : > { %s882_s12 = scalar_lea.hbm %s1121_s20, 16  ;;  %s886_s25 = scalar_lea.hbm %s1172_s7, 32 }
 0x2e8   : > { %p883_p13 = scmp.ne.s32.totalorder %s1121_s20, %s882_s12  ;;  %p887_p6 = scmp.lt.u32.totalorder %s1121_s20, %s1172_s7 }
 0x2e9   : > { %p888_p10 = scmp.lt.u32.totalorder %s886_s25, %s882_s12  ;;  %p890_p0 = scmp.lt.u32.totalorder %s882_s12, %s1121_s20 }
 0x2ea   : > { %p884_p2 = pnand %p883_p13, %p1185_p12 }
 0x2eb   : > { %p889_p11 = por %p888_p10, %p887_p6 }
 0x2ec   : > { %p885_p5 = pneg %p884_p2 }
 0x2ed   : > { %p891_p3 = por %p890_p0, %p889_p11 }
 0x2ef   : > { %p892_p4 = pnand %p891_p3, %p885_p5 }
 0x2f1   : > { %895 = shalt.err (!%p892_p4)
}
 0x2f2   : > { %785 = dma.vmem_to_hbm [thread:$0]  (%p1185_p12), %s1123_s10, 16, %s1121_s20, %s628_s21  }
 0x2f3 PF: > { %s652_s9 = sand.u32 1, %s922_s26   ;;  %p1186_p7 = scmp.ne.s32.totalorder %s1178_s14, 0 }
 0x2f4   : > { %s653_s16 = scalar_lea.sflag [#allocation6], %s652_s9 }
 0x2f5   : > { %p792_p8 = pnand %p716_p1, %p1186_p7 }
 0x2f7   : > { %917 = dma.done.wait (!%p792_p8), %s653_s16, 16  }
 0x2f8   : > { %919 = vsyncadd (!%p792_p8), %s653_s16, 4294967280  ;;  %p20_p9 = scmp.ge.s32.totalorder %s1013_s8, 4   ;;  %s1187_s26 = smov %s926_s27 }
 0x2f9   : > { %s1188_s27 = smov %s930_s28  ;;  %s1189_s28 = smov %s1025_s11 }
 0x2fa   : > { %s1190_s29 = smov %s1013_s8  ;;  %22 = sbr.rel (!%p20_p9) target bundleno = 7 (0x7), region = 131 }
 0x301   :  { %657 = vsyncpa [#allocation5], 1 }
 0x302   :  { %659 = vsyncpa [#allocation5 + $0x1], 1 }
 0x303   :  { %660 = vsyncpa [#allocation6], 1 }
 0x304   :  { %662 = vsyncpa [#allocation6 + $0x1], 1 }

</bundles_post_ra>
